<compile_context>
chip_gen: v6e
topology: v6e:2x2x1
jax: 0.10.0
libtpu: 0.0.40
codegen_flags: <defaults>
</compile_context>

<pallas_src>
import functools

import numpy as np
import jax
import jax.numpy as jnp
from jax.experimental import pallas as pl
from jax.experimental.pallas import tpu as pltpu


def _cdiv(a, b):
    return -(-a // b)


def _round_up(a, b):
    return _cdiv(a, b) * b


# ----------------------------------------------------------------------------
# Kernel A: per-item top-1 most-similar item (self excluded), tiled matmul
# with a running (max, argmax) accumulator -- no full (N, N) sims in VMEM.
# ----------------------------------------------------------------------------
def _top1_table_kernel(q_ref, c_ref, tbl_ref, max_ref, arg_ref, *, n_items):
    i = pl.program_id(0)                       # query tile     ("parallel")
    j = pl.program_id(1)                       # candidate tile ("arbitrary")
    tq = q_ref.shape[0]
    tc = c_ref.shape[0]

    @pl.when(j == 0)
    def _():
        max_ref[...] = jnp.full(max_ref.shape, -jnp.inf, jnp.float32)
        arg_ref[...] = jnp.zeros(arg_ref.shape, jnp.int32)

    # sims[c, q] = <emb_c, emb_q>  (bf16 operands, f32 accumulation on the MXU)
    sims = jax.lax.dot_general(
        c_ref[...], q_ref[...], (((1,), (1,)), ((), ())),
        preferred_element_type=jnp.float32)                         # (tc, tq)

    cand = jax.lax.broadcasted_iota(jnp.int32, (tc, tq), 0) + j * tc
    qry = jax.lax.broadcasted_iota(jnp.int32, (tc, tq), 1) + i * tq
    sims = jnp.where((cand == qry) | (cand >= n_items), jnp.float32(-3e38), sims)

    tile_max = jnp.max(sims, axis=0, keepdims=True)                 # (1, tq)
    tile_arg = jnp.min(
        jnp.where(sims >= tile_max, cand, jnp.int32(2**31 - 1)),
        axis=0, keepdims=True)                                      # (1, tq)

    better = tile_max > max_ref[...]
    arg_ref[...] = jnp.where(better, tile_arg, arg_ref[...])
    max_ref[...] = jnp.where(better, tile_max, max_ref[...])

    @pl.when(j == pl.num_programs(1) - 1)
    def _():
        tbl_ref[...] = arg_ref[...]


def top1_similar_table(item_emb: jax.Array, *, tile_q: int = 256,
                       tile_c: int = 256) -> jax.Array:
    """tbl[q] = argmax_{c != q} <emb_q, emb_c>, as a (n,) int32 array."""
    n, d = item_emb.shape
    tile = max(tile_q, tile_c)
    assert tile % min(tile_q, tile_c) == 0
    n_pad = _round_up(max(n, tile), tile)

    # bf16 operands (f32 accumulation) for full MXU rate; padded rows are zero
    # and masked out inside the kernel via `cand >= n_items`.
    emb = jnp.zeros((n_pad, d), jnp.bfloat16).at[:n].set(
        jnp.asarray(item_emb, jnp.bfloat16))

    tbl = pl.pallas_call(
        functools.partial(_top1_table_kernel, n_items=n),
        out_shape=jax.ShapeDtypeStruct((1, n_pad), jnp.int32),      # lane-dense
        grid=(n_pad // tile_q, n_pad // tile_c),
        in_specs=[
            pl.BlockSpec((tile_q, d), lambda i, j: (i, 0)),         # query rows
            pl.BlockSpec((tile_c, d), lambda i, j: (j, 0)),         # cand rows
        ],
        out_specs=pl.BlockSpec((1, tile_q), lambda i, j: (0, i)),
        scratch_shapes=[pltpu.VMEM((1, tile_q), jnp.float32),       # running max
                        pltpu.VMEM((1, tile_q), jnp.int32)],        # running argmax
        compiler_params=pltpu.CompilerParams(
            dimension_semantics=("parallel", "arbitrary")),
    )(emb, emb)
    return tbl[0, :n]


# ----------------------------------------------------------------------------
# Kernel B: batch-tiled random substitution (lane-dense blocks).
# ----------------------------------------------------------------------------
def _substitute_kernel(seed_ref, seq_ref, top1_ref, meta_ref, out_ref, *,
                       hash_bits, shifts):
    tb, lp = seq_ref.shape
    seq = seq_ref[...]                         # (tb, lp) int32
    top1 = top1_ref[...]                       # (tb, lp) int32  (top-1 of seq)
    meta = meta_ref[...]                       # (tb, 2)  int32
    seq_len = meta[:, 0:1]
    sub_len = meta[:, 1:2]

    row_base = pl.program_id(0) * tb
    pos = jax.lax.broadcasted_iota(jnp.int32, (tb, lp), 1)
    row = jax.lax.broadcasted_iota(jnp.int32, (tb, lp), 0) + row_base
    valid = pos < seq_len

    # Stateless per-(row, position) hash, computed once; composed with the
    # position into a strict (collision-free within a row) ordering key.
    seed_u = seed_ref[0].astype(jnp.uint32)
    h = (row.astype(jnp.uint32) * jnp.uint32(0x9E3779B1)) \
        ^ (pos.astype(jnp.uint32) * jnp.uint32(0x85EBCA77)) ^ seed_u
    h = h ^ (h >> 16)
    h = h * jnp.uint32(0x7FEB352D)
    h = h ^ (h >> 15)
    h = h * jnp.uint32(0x846CA68B)
    h = h ^ (h >> 16)
    sub_key = (h >> (32 - hash_bits)).astype(jnp.int32)   # [0, 2**hash_bits)
    key_p = sub_key * lp + pos                            # strict order, < 2**30
    key_p = jnp.where(valid, key_p, jnp.int32(2**31 - 1)) # pads never "before"

    # rank[p] = #{valid q != p in the same row : key[q] < key[p]}.
    # key[q] is fetched with an XLU lane rotation of key_p (rows = sublanes, so
    # a roll along axis=1 never mixes sequences).  The shift set is symmetric
    # under s -> lp - s, so coverage is independent of the rotate direction,
    # and invalid sources carry the sentinel (never counted).
    rank = jnp.zeros((tb, lp), jnp.int32)
    for s in shifts:                                      # static shifts
        key_q = pltpu.roll(key_p, shift=s, axis=1)
        rank = rank + (key_q < key_p).astype(jnp.int32)

    sub_mask = valid & (rank < sub_len)                   # exactly sub_len / row
    out_ref[...] = jnp.where(sub_mask, top1, seq)


def _pick_tile_batch(batch, requested):
    tb = max(8, min(int(requested), batch))
    tb -= tb % 8
    tb = max(8, tb)
    # Prefer >= 2 grid steps so both v7x TensorCores get work (no-op on v5e/v6e).
    if batch >= 16 and _cdiv(batch, tb) < 2:
        tb = max(8, (batch // 2) - ((batch // 2) % 8))
    return tb


def item_substitute_pallas(sequences, seq_lens, top1_tbl, substitute_rate, seed,
                           tile_batch=256):
    b, lt = sequences.shape
    lp = _round_up(max(lt, 128), 128)          # lane-dense blocks, unmasked stores
    hash_bits = 30 - (lp - 1).bit_length()

    # Exact reference sub_len (Python float64 `max(1, int(rate*len))`) per length.
    sub_tab = np.asarray([max(1, int(substitute_rate * l)) for l in range(lt + 1)],
                         dtype=np.int32)

    seq_i = jnp.asarray(sequences, jnp.int32)
    lens_i = jnp.asarray(seq_lens, jnp.int32)
    sub_i = jnp.take(jnp.asarray(sub_tab), jnp.clip(lens_i, 0, lt))
    # item -> top-1 substitute: one small XLA gather over B*L indices (removes
    # any O(n_items) work and the item table from the kernel entirely).
    top1_seq = jnp.take(jnp.asarray(top1_tbl, jnp.int32), seq_i)

    tb = _pick_tile_batch(b, tile_batch)
    b_pad = _round_up(b, tb)

    seq_p = jnp.zeros((b_pad, lp), jnp.int32).at[:b, :lt].set(seq_i)
    top1_p = jnp.zeros((b_pad, lp), jnp.int32).at[:b, :lt].set(top1_seq)
    meta_p = (jnp.zeros((b_pad, 2), jnp.int32)
              .at[:b, 0].set(lens_i).at[:b, 1].set(sub_i))
    seed_arr = jnp.asarray([seed], jnp.int32)

    # Only lane shifts that can pair two valid (p < seq_width) positions.
    shifts = tuple(sorted(set(range(1, min(lt, lp)))
                          | set(range(max(1, lp - lt + 1), lp))))

    kernel = functools.partial(_substitute_kernel, hash_bits=hash_bits,
                               shifts=shifts)
    out = pl.pallas_call(
        kernel,
        out_shape=jax.ShapeDtypeStruct((b_pad, lp), jnp.int32),
        grid_spec=pltpu.PrefetchScalarGridSpec(
            num_scalar_prefetch=1,                               # seed -> SMEM
            grid=(b_pad // tb,),
            in_specs=[
                pl.BlockSpec((tb, lp), lambda i, *_: (i, 0)),    # sequences
                pl.BlockSpec((tb, lp), lambda i, *_: (i, 0)),    # top-1 of items
                pl.BlockSpec((tb, 2), lambda i, *_: (i, 0)),     # (seq_len, sub_len)
            ],
            out_specs=pl.BlockSpec((tb, lp), lambda i, *_: (i, 0)),
        ),
        compiler_params=pltpu.CompilerParams(
            dimension_semantics=("parallel",)),
    )(seed_arr, seq_p, top1_p, meta_p)
    return out[:b, :lt]


class ItemSubstitute:
    """JAX/Pallas port of recstudio `Item_Substitute` (single-model path).

    The `item_similarity_model` is represented by an item-embedding table; the
    top-1 most-similar item (self excluded, dot-product similarity) is
    precomputed once by a tiled Pallas MXU kernel and applied per sequence
    position by a batch-tiled Pallas kernel.
    """

    def __init__(self, item_embeddings, substitute_rate=0.1):
        self.item_embeddings = jnp.asarray(item_embeddings, jnp.float32)
        self.substitute_rate = float(substitute_rate)
        # TODO(synk): ensemble path (_ensemble_sim_models over two similarity
        # models with score comparison) not ported; single-model branch only.
        self.ensemble = False
        self._top1_tbl = None

    def forward(self, sequences, seq_lens, seed=0, tile_batch=256):
        if self._top1_tbl is None:
            self._top1_tbl = top1_similar_table(self.item_embeddings)
        out = item_substitute_pallas(sequences, seq_lens, self._top1_tbl,
                                     self.substitute_rate, seed, tile_batch)
        return out, seq_lens


if __name__ == "__main__":
    key = jax.random.PRNGKey(0)
    B, L, N_ITEMS, D = 16, 16, 64, 32
    k_len, k_seq, k_emb = jax.random.split(key, 3)

    seq_lens = jax.random.randint(k_len, (B,), 4, L + 1, dtype=jnp.int32)
    sequences = jax.random.randint(k_seq, (B, L), 1, N_ITEMS, dtype=jnp.int32)
    pos = jnp.arange(L, dtype=jnp.int32)[None, :]
    sequences = jnp.where(pos < seq_lens[:, None], sequences, 0)   # 0 = pad id
    item_emb = jax.random.normal(k_emb, (N_ITEMS, D), dtype=jnp.float32)

    rate = 0.2
    mod = ItemSubstitute(item_emb, substitute_rate=rate)
    out, out_lens = mod.forward(sequences, seq_lens, seed=1234)
    jax.block_until_ready(out)

    # ---------------- verification against a host-side reference -------------
    tbl = np.asarray(mod._top1_tbl)                                 # (N,)
    emb_bf = np.asarray(jnp.asarray(item_emb, jnp.bfloat16).astype(jnp.float32))
    S = emb_bf @ emb_bf.T                                           # bf16-input sims
    np.fill_diagonal(S, -np.inf)
    for q in range(N_ITEMS):
        assert 0 <= tbl[q] < N_ITEMS and tbl[q] != q
        assert S[q, tbl[q]] >= S[q].max() - 1e-3 * (1.0 + abs(S[q].max()))

    seq_np = np.asarray(sequences)
    out_np = np.asarray(out)
    lens_np = np.asarray(seq_lens)
    assert out_np.shape == (B, L)
    assert np.array_equal(np.asarray(out_lens), lens_np)
    for i in range(B):
        l = int(lens_np[i])
        exp_sub = max(1, int(rate * l))
        diff = np.nonzero(out_np[i] != seq_np[i])[0]
        assert len(diff) == exp_sub, (i, len(diff), exp_sub)        # exact count
        assert (diff < l).all()                                     # valid prefix only
        assert np.array_equal(out_np[i, l:], seq_np[i, l:])         # padding untouched
        for p in diff:
            assert out_np[i, p] == tbl[seq_np[i, p]]                # top-1 substitute

    print("KERNEL_OK")
</pallas_src>

<mosaic_0001>
module attributes {stable_mosaic.version = 11 : i64} {
  func.func @_top1_table_kernel(%arg0: i32, %arg1: i32, %arg2: memref<256x32xbf16, #tpu.memory_space<vmem>>, %arg3: memref<256x32xbf16, #tpu.memory_space<vmem>>, %arg4: memref<1x256xi32, #tpu.memory_space<vmem>>, %arg5: memref<1x256xf32, #tpu.memory_space<vmem>>, %arg6: memref<1x256xi32, #tpu.memory_space<vmem>>) attributes {dimension_semantics = [#tpu.dimension_semantics<parallel>, #tpu.dimension_semantics<arbitrary>], iteration_bounds = array<i64: 1, 1>, scalar_prefetch = 0 : i64, scratch_operands = 2 : i64, tpu.core_type = #tpu.core_type<tc>, window_params = [{transform_indices = @transform_0, window_bounds = array<i64: 256, 32>}, {transform_indices = @transform_1, window_bounds = array<i64: 256, 32>}, {transform_indices = @transform_2, window_bounds = array<i64: 1, 256>}]} {
    %c0_i32 = arith.constant 0 : i32
    %0 = arith.cmpi eq, %arg1, %c0_i32 : i32
    %1 = arith.extui %0 : i1 to i32
    %c0_i32_0 = arith.constant 0 : i32
    %2 = arith.cmpi ne, %1, %c0_i32_0 : i32
    scf.if %2 {
      %cst_20 = arith.constant 0xFF800000 : f32
      %39 = vector.broadcast %cst_20 : f32 to vector<1x256xf32>
      %c0_21 = arith.constant 0 : index
      %c0_22 = arith.constant 0 : index
      %40 = vector.load %arg5[%c0_21, %c0_22] : memref<1x256xf32, #tpu.memory_space<vmem>>, vector<1x256xf32>
      tpu.vector_store %arg5[%c0_21, %c0_22], %39 {strides = array<i32>} : memref<1x256xf32, #tpu.memory_space<vmem>>, vector<1x256xf32>,
      %c0_i32_23 = arith.constant 0 : i32
      %41 = vector.broadcast %c0_i32_23 : i32 to vector<1x256xi32>
      %c0_24 = arith.constant 0 : index
      %c0_25 = arith.constant 0 : index
      %42 = vector.load %arg6[%c0_24, %c0_25] : memref<1x256xi32, #tpu.memory_space<vmem>>, vector<1x256xi32>
      tpu.vector_store %arg6[%c0_24, %c0_25], %41 {strides = array<i32>} : memref<1x256xi32, #tpu.memory_space<vmem>>, vector<1x256xi32>,
    } else {
    }
    %c0 = arith.constant 0 : index
    %c0_1 = arith.constant 0 : index
    %3 = vector.load %arg3[%c0, %c0_1] : memref<256x32xbf16, #tpu.memory_space<vmem>>, vector<256x32xbf16>
    %c0_2 = arith.constant 0 : index
    %c0_3 = arith.constant 0 : index
    %4 = vector.load %arg2[%c0_2, %c0_3] : memref<256x32xbf16, #tpu.memory_space<vmem>>, vector<256x32xbf16>
    %cst = arith.constant dense<0.000000e+00> : vector<256x256xf32>
    %5 = tpu.matmul %3, %4, %cst {dimension_numbers = #tpu.dot_dimension_numbers<[1], [1], [0], [0], [0, 0, 1, 0], [], []>} : vector<256x32xbf16>, vector<256x32xbf16>, vector<256x256xf32> -> vector<256x256xf32>
    %6 = tpu.iota {dimensions = array<i32: 0>} : vector<256x256xi32>
    %c256_i32 = arith.constant 256 : i32
    %7 = arith.muli %arg1, %c256_i32 : i32
    %8 = vector.broadcast %7 : i32 to vector<256x256xi32>
    %9 = arith.addi %6, %8 : vector<256x256xi32>
    %10 = tpu.iota {dimensions = array<i32: 1>} : vector<256x256xi32>
    %c256_i32_4 = arith.constant 256 : i32
    %11 = arith.muli %arg0, %c256_i32_4 : i32
    %12 = vector.broadcast %11 : i32 to vector<256x256xi32>
    %13 = arith.addi %10, %12 : vector<256x256xi32>
    %14 = arith.cmpi eq, %9, %13 : vector<256x256xi32>
    %c64_i32 = arith.constant 64 : i32
    %15 = vector.broadcast %c64_i32 : i32 to vector<256x256xi32>
    %16 = arith.cmpi sge, %9, %15 : vector<256x256xi32>
    %17 = arith.ori %14, %16 : vector<256x256xi1>
    %cst_5 = arith.constant -3.000000e+38 : f32
    %18 = vector.broadcast %cst_5 : f32 to vector<256x256xf32>
    %19 = arith.select %17, %18, %5 : vector<256x256xi1>, vector<256x256xf32>
    %cst_6 = arith.constant dense<0xFF800000> : vector<256xf32>
    %20 = vector.multi_reduction <maximumf>, %19, %cst_6 [0] : vector<256x256xf32> to vector<256xf32>
    %21 = vector.shape_cast %20 : vector<256xf32> to vector<1x256xf32>
    %22 = vector.broadcast %21 : vector<1x256xf32> to vector<256x256xf32>
    %23 = arith.cmpf oge, %19, %22 : vector<256x256xf32>
    %c2147483647_i32 = arith.constant 2147483647 : i32
    %24 = vector.broadcast %c2147483647_i32 : i32 to vector<256x256xi32>
    %25 = arith.select %23, %9, %24 : vector<256x256xi1>, vector<256x256xi32>
    %cst_7 = arith.constant dense<2147483647> : vector<256xi32>
    %26 = vector.multi_reduction <minsi>, %25, %cst_7 [0] : vector<256x256xi32> to vector<256xi32>
    %27 = vector.shape_cast %26 : vector<256xi32> to vector<1x256xi32>
    %c0_8 = arith.constant 0 : index
    %c0_9 = arith.constant 0 : index
    %28 = vector.load %arg5[%c0_8, %c0_9] : memref<1x256xf32, #tpu.memory_space<vmem>>, vector<1x256xf32>
    %29 = arith.cmpf ogt, %21, %28 : vector<1x256xf32>
    %c0_10 = arith.constant 0 : index
    %c0_11 = arith.constant 0 : index
    %30 = vector.load %arg6[%c0_10, %c0_11] : memref<1x256xi32, #tpu.memory_space<vmem>>, vector<1x256xi32>
    %31 = arith.select %29, %27, %30 : vector<1x256xi1>, vector<1x256xi32>
    %c0_12 = arith.constant 0 : index
    %c0_13 = arith.constant 0 : index
    %32 = vector.load %arg6[%c0_12, %c0_13] : memref<1x256xi32, #tpu.memory_space<vmem>>, vector<1x256xi32>
    tpu.vector_store %arg6[%c0_12, %c0_13], %31 {strides = array<i32>} : memref<1x256xi32, #tpu.memory_space<vmem>>, vector<1x256xi32>,
    %c0_14 = arith.constant 0 : index
    %c0_15 = arith.constant 0 : index
    %33 = vector.load %arg5[%c0_14, %c0_15] : memref<1x256xf32, #tpu.memory_space<vmem>>, vector<1x256xf32>
    %34 = arith.select %29, %21, %33 : vector<1x256xi1>, vector<1x256xf32>
    %c0_16 = arith.constant 0 : index
    %c0_17 = arith.constant 0 : index
    %35 = vector.load %arg5[%c0_16, %c0_17] : memref<1x256xf32, #tpu.memory_space<vmem>>, vector<1x256xf32>
    tpu.vector_store %arg5[%c0_16, %c0_17], %34 {strides = array<i32>} : memref<1x256xf32, #tpu.memory_space<vmem>>, vector<1x256xf32>,
    %c0_i32_18 = arith.constant 0 : i32
    %36 = arith.cmpi eq, %arg1, %c0_i32_18 : i32
    %37 = arith.extui %36 : i1 to i32
    %c0_i32_19 = arith.constant 0 : i32
    %38 = arith.cmpi ne, %37, %c0_i32_19 : i32
    scf.if %38 {
      %c0_20 = arith.constant 0 : index
      %c0_21 = arith.constant 0 : index
      %39 = vector.load %arg6[%c0_20, %c0_21] : memref<1x256xi32, #tpu.memory_space<vmem>>, vector<1x256xi32>
      %c0_22 = arith.constant 0 : index
      %c0_23 = arith.constant 0 : index
      %40 = vector.load %arg4[%c0_22, %c0_23] : memref<1x256xi32, #tpu.memory_space<vmem>>, vector<1x256xi32>
      tpu.vector_store %arg4[%c0_22, %c0_23], %39 {strides = array<i32>} : memref<1x256xi32, #tpu.memory_space<vmem>>, vector<1x256xi32>,
    } else {
    }
    return
  }
  func.func @transform_0(%arg0: i32, %arg1: i32) -> (i32, i32) {
    %c0_i32 = arith.constant 0 : i32
    %c0_i32_0 = arith.constant 0 : i32
    return %arg0, %c0_i32 : i32, i32
  }
  func.func @transform_1(%arg0: i32, %arg1: i32) -> (i32, i32) {
    %c0_i32 = arith.constant 0 : i32
    %c0_i32_0 = arith.constant 0 : i32
    return %arg1, %c0_i32 : i32, i32
  }
  func.func @transform_2(%arg0: i32, %arg1: i32) -> (i32, i32) {
    %c0_i32 = arith.constant 0 : i32
    %c0_i32_0 = arith.constant 0 : i32
    return %c0_i32, %arg0 : i32, i32
  }
}

</mosaic_0001>

<bundles_post_ra>
// kernel: tpu_custom_call.1
= control target key start
LH: loop header
LB: loop body
LE: loop exit
PB: predicated region body
PF: predicated region fallthrough
CT: control target
= control target key end

     0   :  { %vm247_vm0 = vcmask 261120   ;;  %s2134_s0 = inlined_call_operand.vmem [shape: bf16[256,32], index: 0, kind: input, shape index: {}]   ;;  %s2135_s1 = inlined_call_operand.vmem [shape: bf16[256,32], index: 1, kind: input, shape index: {}]   ;;  %s2136_s2 = inlined_call_operand.hbm [shape: s32[1,256], index: 2, kind: output, shape index: {}]  }
   0x1   :  { %v1456_v0 = vld [vmem:[%s2134_s0 + $0x78] sm:$0xff]   ;;  %v1458_v2 = vld [vmem:[%s2134_s0 + $0x70] sm:$0xff]   ;;  %v1460_v6 = vld [vmem:[%s2134_s0 + $0x68] sm:$0xff]  }
   0x2   :  { %v1457_v1 = vld [vmem:[%s2134_s0 + $0x38] sm:$0xff]   ;;  %1436 = vmatprep.subr.msk.bf16.mxu0 %vm247_vm0, %v1456_v0  ;;  %1437 = vmatprep.subr.msk.bf16.mxu1 %vm247_vm0, %v1456_v0  ;;  %v1459_v4 = vld [vmem:[%s2134_s0 + $0x30] sm:$0xff]   ;;  %v1461_v7 = vld [vmem:[%s2134_s0 + $0x28] sm:$0xff]  }
   0x3   :  { %v318_v3 = vsel %vm247_vm0, %v1457_v1, 0  ;;  %v315_v5 = vsel %vm247_vm0, %v1459_v4, 0  ;;  %v1472_v8 = vld [vmem:[%s2135_s1] sm:$0xff]   ;;  %v312_v9 = vsel %vm247_vm0, %v1461_v7, 0  ;;  %v1464_v14 = vld [vmem:[%s2134_s0 + $0x58] sm:$0xff]  }
   0x4   :  { %1373 = vmatpush3.bf16.xpose.msra.mxu0 %v318_v3  ;;  %1428 = vmatpush3.bf16.xpose.msra.mxu1 %v318_v3  ;;  %v1462_v10 = vld [vmem:[%s2134_s0 + $0x60] sm:$0xff]   ;;  %v1465_v15 = vld [vmem:[%s2134_s0 + $0x18] sm:$0xff]  }
   0x5   :  { %1438 = vmatprep.subr.msk.bf16.mxu0 %vm247_vm0, %v1458_v2  ;;  %1439 = vmatprep.subr.msk.bf16.mxu1 %vm247_vm0, %v1458_v2  ;;  %v1476_v11 = vld [vmem:[%s2135_s1 + $0x40] sm:$0xff]  }
   0x6   :  { %1388 = vmatprep.mubr.msk.bf16.mxu0 %vm247_vm0, %v1472_v8  ;;  %v1463_v12 = vld [vmem:[%s2134_s0 + $0x20] sm:$0xff]   ;;  %1404 = vmatprep.mubr.msk.bf16.mxu1 %vm247_vm0, %v1476_v11 }
   0x7   :  { %v309_v13 = vsel %vm247_vm0, %v1463_v12, 0 }
   0xc   :  { %1375 = vmatpush3.bf16.xpose.msra.mxu0 %v315_v5  ;;  %1429 = vmatpush3.bf16.xpose.msra.mxu1 %v315_v5 }
   0xd   :  { %1440 = vmatprep.subr.msk.bf16.mxu0 %vm247_vm0, %v1460_v6  ;;  %1441 = vmatprep.subr.msk.bf16.mxu1 %vm247_vm0, %v1460_v6 }
  0x14   :  { %1377 = vmatpush3.bf16.xpose.msra.mxu0 %v312_v9  ;;  %1430 = vmatpush3.bf16.xpose.msra.mxu1 %v312_v9 }
  0x15   :  { %1442 = vmatprep.subr.msk.bf16.mxu0 %vm247_vm0, %v1462_v10  ;;  %1443 = vmatprep.subr.msk.bf16.mxu1 %vm247_vm0, %v1462_v10 }
  0x1c   :  { %1379 = vmatpush3.bf16.xpose.msra.mxu0 %v309_v13  ;;  %1431 = vmatpush3.bf16.xpose.msra.mxu1 %v309_v13 }
  0x1d   :  { %1444 = vmatprep.subr.msk.bf16.mxu0 %vm247_vm0, %v1464_v14  ;;  %1445 = vmatprep.subr.msk.bf16.mxu1 %vm247_vm0, %v1464_v14 }
  0x1e   :  { %7 = vsyncpa [#allocation5], 0  ;;  %v306_v16 = vsel %vm247_vm0, %v1465_v15, 0  ;;  %v1466_v17 = vld [vmem:[%s2134_s0 + $0x50] sm:$0xff]   ;;  %v1468_v20 = vld [vmem:[%s2134_s0 + $0x48] sm:$0xff]   ;;  %v17_v40 = vlaneseq  ;;  %v2145_v41 = vmov 0 }
  0x1f   :  { %v1467_v18 = vld [vmem:[%s2134_s0 + $0x10] sm:$0xff]   ;;  %v1469_v21 = vld [vmem:[%s2134_s0 + $0x8] sm:$0xff]   ;;  %v1470_v23 = vld [vmem:[%s2134_s0 + $0x40] sm:$0xff]   ;;  %v1510_v42 = vmov -inf   ;;  %v1511_v51 = vmov 0  }
  0x20   :  { %v303_v19 = vsel %vm247_vm0, %v1467_v18, 0  ;;  %v300_v22 = vsel %vm247_vm0, %v1469_v21, 0  ;;  %v1471_v24 = vld [vmem:[%s2134_s0] sm:$0xff]   ;;  %v1473_v26 = vld [vmem:[%s2135_s1 + $0x8] sm:$0xff]   ;;  %v1474_v28 = vld [vmem:[%s2135_s1 + $0x10] sm:$0xff]   ;;  %vm1681_vm1 = vcmp.lt.s32.totalorder %v17_v40, 256 }
  0x21   :  { %v297_v25 = vsel %vm247_vm0, %v1471_v24, 0  ;;  %v1477_v27 = vld [vmem:[%s2135_s1 + $0x48] sm:$0xff]   ;;  %v1478_v29 = vld [vmem:[%s2135_s1 + $0x50] sm:$0xff]   ;;  %v1475_v30 = vld [vmem:[%s2135_s1 + $0x18] sm:$0xff]   ;;  %v2146_v41 = vsel %vm1681_vm1, 4294967295, %v2145_v41  ;;  %v1693_v54 = vshrl.u32 %v17_v40, 7 }
  0x22   :  { %v1479_v31 = vld [vmem:[%s2135_s1 + $0x58] sm:$0xff]   ;;  %v1480_v32 = vld [vmem:[%s2135_s1 + $0x20] sm:$0xff]   ;;  %v1482_v34 = vld [vmem:[%s2135_s1 + $0x28] sm:$0xff]   ;;  %2147 = vst [vmem:[#allocation7_spill] sm:$0xff] %v2146_v41  ;;  %v605_v60 = vand.u32 127, %v17_v40 }
  0x23   :  { %v1481_v33 = vld [vmem:[%s2135_s1 + $0x60] sm:$0xff]   ;;  %v1483_v35 = vld [vmem:[%s2135_s1 + $0x68] sm:$0xff]   ;;  %v1484_v36 = vld [vmem:[%s2135_s1 + $0x30] sm:$0xff]   ;;  %21 = vst.msk [vmem:[#allocation2] sm:$0x3] %vm1681_vm1, %v1510_v42  ;;  %v1698_v57 = vadd.s32 16, %v1693_v54 }
  0x24   :  { %1381 = vmatpush3.bf16.xpose.msra.mxu0 %v306_v16  ;;  %1432 = vmatpush3.bf16.xpose.msra.mxu1 %v306_v16  ;;  %v1485_v37 = vld [vmem:[%s2135_s1 + $0x70] sm:$0xff]   ;;  %v1486_v38 = vld [vmem:[%s2135_s1 + $0x38] sm:$0xff]   ;;  %22 = vst.msk [vmem:[#allocation3] sm:$0x3] %vm1681_vm1, %v1511_v51  ;;  %v1703_v62 = vadd.s32 32, %v1693_v54  ;;  %v1707_v0 = vadd.s32 24, %v1693_v54  ;;  %vm611_vm3 = vcmp.eq.s32.totalorder %v1693_v54, %v605_v60 }
  0x25   :  { %1446 = vmatprep.subr.msk.bf16.mxu0 %vm247_vm0, %v1466_v17  ;;  %1447 = vmatprep.subr.msk.bf16.mxu1 %vm247_vm0, %v1466_v17  ;;  %v1487_v39 = vld [vmem:[%s2135_s1 + $0x78] sm:$0xff]   ;;  %vm615_vm2 = vcmp.eq.s32.totalorder %v1698_v57, %v605_v60  ;;  %v1710_v3 = vadd.s32 8, %v1693_v54  ;;  %v1717_v5 = vadd.s32 40, %v1693_v54  ;;  %v1720_v6 = vadd.s32 48, %v1693_v54  ;;  %s1513_s1 = smov [#allocation4]  }
  0x26   :  { %vm619_vm4 = vcmp.eq.s32.totalorder %v1703_v62, %v605_v60  ;;  %vm617_vm5 = vcmp.eq.s32.totalorder %v1707_v0, %v605_v60  ;;  %v1737_v15 = vadd.s32 56, %v1693_v54  ;;  %s1268_s16 = sshll.u32 %s1513_s1, 4  ;;  %s1269_s16 = int_to_ptr.vmem [resolvable:$true] %s1268_s16 }
  0x27   :  { %vm613_vm6 = vcmp.eq.s32.totalorder %v1710_v3, %v605_v60  ;;  %vm621_vm7 = vcmp.eq.s32.totalorder %v1717_v5, %v605_v60  ;;  %vm623_vm8 = vcmp.eq.s32.totalorder %v1720_v6, %v605_v60  ;;  %s1488_s17 = scalar_lea.vmem %s1269_s16, 32  ;;  %p1493_p1 = scmp.lt.s32.totalorder %s1269_s16, %s1269_s16 }
  0x28   :  { %vm625_vm9 = vcmp.eq.s32.totalorder %v1737_v15, %v605_v60  ;;  %p1489_p0 = scmp.ne.s32.totalorder %s1269_s16, %s1488_s17  ;;  %p1494_p2 = scmp.lt.s32.totalorder %s1488_s17, %s1488_s17 }
  0x2a   :  { %p1495_p3 = por %p1494_p2, %p1493_p1 }
  0x2c   :  { %1383 = vmatpush3.bf16.xpose.msra.mxu0 %v303_v19  ;;  %1433 = vmatpush3.bf16.xpose.msra.mxu1 %v303_v19  ;;  %p1496_p4 = pnand %p1495_p3, %p1489_p0 }
  0x2d   :  { %1448 = vmatprep.subr.msk.bf16.mxu0 %vm247_vm0, %v1468_v20  ;;  %1449 = vmatprep.subr.msk.bf16.mxu1 %vm247_vm0, %v1468_v20 }
  0x34   :  { %1385 = vmatpush3.bf16.xpose.msra.mxu0 %v300_v22  ;;  %1434 = vmatpush3.bf16.xpose.msra.mxu1 %v300_v22 }
  0x35   :  { %1450 = vmatprep.subr.msk.bf16.mxu0 %vm247_vm0, %v1470_v23  ;;  %1451 = vmatprep.subr.msk.bf16.mxu1 %vm247_vm0, %v1470_v23 }
  0x3c   :  { %1387 = vmatpush3.bf16.xpose.msra.mxu0 %v297_v25  ;;  %1435 = vmatpush3.bf16.xpose.msra.mxu1 %v297_v25 }
  0x43   :  { %1389 = vmatmul.mubr.msk.bf16.vlgmr.msra.gmra.mxu0 %vm247_vm0, %v1472_v8  ;;  %1405 = vmatmul.mubr.msk.bf16.vlgmr.msra.gmra.mxu1 %vm247_vm0, %v1476_v11 }
  0x44   :  { %1390 = vmatprep.mubr.msk.bf16.mxu0 %vm247_vm0, %v1473_v26  ;;  %1406 = vmatprep.mubr.msk.bf16.mxu1 %vm247_vm0, %v1477_v27 }
  0x4b   :  { %1391 = vmatmul.mubr.msk.bf16.gmra.mxu0 %vm247_vm0, %v1473_v26  ;;  %1407 = vmatmul.mubr.msk.bf16.gmra.mxu1 %vm247_vm0, %v1477_v27 }
  0x4c   :  { %1392 = vmatprep.mubr.msk.bf16.mxu0 %vm247_vm0, %v1474_v28  ;;  %1408 = vmatprep.mubr.msk.bf16.mxu1 %vm247_vm0, %v1478_v29 }
  0x53   :  { %1393 = vmatmul.mubr.msk.bf16.gmra.mxu0 %vm247_vm0, %v1474_v28  ;;  %1409 = vmatmul.mubr.msk.bf16.gmra.mxu1 %vm247_vm0, %v1478_v29 }
  0x54   :  { %1394 = vmatprep.mubr.msk.bf16.mxu0 %vm247_vm0, %v1475_v30  ;;  %1410 = vmatprep.mubr.msk.bf16.mxu1 %vm247_vm0, %v1479_v31 }
  0x5b   :  { %1395 = vmatmul.mubr.msk.bf16.gmra.mxu0 %vm247_vm0, %v1475_v30  ;;  %1411 = vmatmul.mubr.msk.bf16.gmra.mxu1 %vm247_vm0, %v1479_v31 }
  0x5c   :  { %1396 = vmatprep.mubr.msk.bf16.mxu0 %vm247_vm0, %v1480_v32  ;;  %1412 = vmatprep.mubr.msk.bf16.mxu1 %vm247_vm0, %v1481_v33 }
  0x63   :  { %1397 = vmatmul.mubr.msk.bf16.gmra.mxu0 %vm247_vm0, %v1480_v32  ;;  %1413 = vmatmul.mubr.msk.bf16.gmra.mxu1 %vm247_vm0, %v1481_v33 }
  0x64   :  { %1398 = vmatprep.mubr.msk.bf16.mxu0 %vm247_vm0, %v1482_v34  ;;  %1414 = vmatprep.mubr.msk.bf16.mxu1 %vm247_vm0, %v1483_v35 }
  0x6b   :  { %1399 = vmatmul.mubr.msk.bf16.gmra.mxu0 %vm247_vm0, %v1482_v34  ;;  %1415 = vmatmul.mubr.msk.bf16.gmra.mxu1 %vm247_vm0, %v1483_v35 }
  0x6c   :  { %1400 = vmatprep.mubr.msk.bf16.mxu0 %vm247_vm0, %v1484_v36  ;;  %1416 = vmatprep.mubr.msk.bf16.mxu1 %vm247_vm0, %v1485_v37 }
  0x73   :  { %1401 = vmatmul.mubr.msk.bf16.gmra.mxu0 %vm247_vm0, %v1484_v36  ;;  %1417 = vmatmul.mubr.msk.bf16.gmra.mxu1 %vm247_vm0, %v1485_v37 }
  0x74   :  { %1402 = vmatprep.mubr.msk.bf16.mxu0 %vm247_vm0, %v1486_v38  ;;  %1418 = vmatprep.mubr.msk.bf16.mxu1 %vm247_vm0, %v1487_v39 }
  0x7b   :  { %1403 = vmatmul.mubr.msk.bf16.gmra.mxu0 %vm247_vm0, %v1486_v38  ;;  %1419 = vmatmul.mubr.msk.bf16.gmra.mxu1 %vm247_vm0, %v1487_v39 }
 0x103   :  { %v378_v43 = vpop.f32.mrf.mxu0  ;;  %v458_v44 = vpop.f32.mrf.mxu1 }
 0x104   :  { %v1725_v11 = vsel %vm611_vm3, -3e+38, %v378_v43 }
 0x105   :  { %v1687_v45 = vpop.f32.mrf.mxu0  ;;  %v460_v46 = vpop.f32.mrf.mxu1 }
 0x107   :  { %v382_v47 = vpop.f32.mrf.mxu0  ;;  %v462_v48 = vpop.f32.mrf.mxu1 }
 0x108   :  { %v1744_v22 = vsel %vm613_vm6, -3e+38, %v382_v47 }
 0x109   :  { %v1689_v49 = vpop.f32.mrf.mxu0  ;;  %v464_v50 = vpop.f32.mrf.mxu1 }
 0x10b   :  { %v388_v52 = vpop.f32.mrf.mxu0  ;;  %v468_v53 = vpop.f32.mrf.mxu1 }
 0x10c   :  { %v1722_v8 = vsel %vm615_vm2, -3e+38, %v388_v52 }
 0x10d   :  { %v1695_v55 = vpop.f32.mrf.mxu0  ;;  %v470_v56 = vpop.f32.mrf.mxu1  ;;  %v835_v13 = vmax.f32 %v1725_v11, %v1722_v8 }
 0x10e   :  { %v872_v17 = vmax.f32 %v1687_v45, %v1695_v55 }
 0x10f   :  { %v392_v58 = vpop.f32.mrf.mxu0  ;;  %v472_v59 = vpop.f32.mrf.mxu1 }
 0x110   :  { %v1741_v18 = vsel %vm617_vm5, -3e+38, %v392_v58 }
 0x111   :  { %v1700_v61 = vpop.f32.mrf.mxu0  ;;  %v474_v63 = vpop.f32.mrf.mxu1  ;;  %v836_v26 = vmax.f32 %v1744_v22, %v1741_v18 }
 0x112   :  { %v873_v30 = vmax.f32 %v1689_v49, %v1700_v61 }
 0x113   :  { %v398_v1 = vpop.f32.mrf.mxu0  ;;  %v478_v2 = vpop.f32.mrf.mxu1 }
 0x114   :  { %v1728_v12 = vsel %vm619_vm4, -3e+38, %v398_v1 }
 0x115   :  { %v1714_v4 = vpop.f32.mrf.mxu0  ;;  %v480_v7 = vpop.f32.mrf.mxu1  ;;  %v837_v19 = vmax.f32 %v835_v13, %v1728_v12 }
 0x116   :  { %v874_v23 = vmax.f32 %v872_v17, %v1714_v4 }
 0x117   :  { %v402_v9 = vpop.f32.mrf.mxu0  ;;  %v482_v10 = vpop.f32.mrf.mxu1 }
 0x118   :  { %v1747_v24 = vsel %vm621_vm7, -3e+38, %v402_v9 }
 0x119   :  { %v1733_v14 = vpop.f32.mrf.mxu0  ;;  %v484_v16 = vpop.f32.mrf.mxu1  ;;  %v838_v32 = vmax.f32 %v836_v26, %v1747_v24 }
 0x11a   :  { %v875_v36 = vmax.f32 %v873_v30, %v1733_v14 }
 0x11b   :  { %v408_v20 = vpop.f32.mrf.mxu0  ;;  %v488_v21 = vpop.f32.mrf.mxu1 }
 0x11c   :  { %v1749_v25 = vsel %vm623_vm8, -3e+38, %v408_v20 }
 0x11d   :  { %v839_v27 = vmax.f32 %v837_v19, %v1749_v25  ;;  %v1754_v28 = vpop.f32.mrf.mxu0  ;;  %v490_v29 = vpop.f32.mrf.mxu1 }
 0x11e   :  { %v876_v31 = vmax.f32 %v874_v23, %v1754_v28 }
 0x11f   :  { %v841_v33 = vmax.f32 %v839_v27, -3e+38  ;;  %v412_v34 = vpop.f32.mrf.mxu0  ;;  %v492_v35 = vpop.f32.mrf.mxu1 }
 0x120   :  { %v878_v37 = vmax.f32 %v876_v31, -3e+38  ;;  %v1762_v38 = vsel %vm625_vm9, -3e+38, %v412_v34 }
 0x121   :  { %v843_v39 = vmax.f32 %v841_v33, -3e+38  ;;  %v840_v40 = vmax.f32 %v838_v32, %v1762_v38  ;;  %v1765_v42 = vpop.f32.mrf.mxu0  ;;  %v494_v43 = vpop.f32.mrf.mxu1 }
 0x122   :  { %v880_v44 = vmax.f32 %v878_v37, -3e+38  ;;  %v877_v46 = vmax.f32 %v875_v36, %v1765_v42 }
 0x123   :  { %v845_v47 = vmax.f32 %v843_v39, -3e+38  ;;  %v842_v48 = vmax.f32 %v840_v40, -3e+38  ;;  %v418_v50 = vpop.f32.mrf.mxu0  ;;  %v498_v51 = vpop.f32.mrf.mxu1 }
 0x124   :  { %v882_v52 = vmax.f32 %v880_v44, -3e+38  ;;  %v879_v53 = vmax.f32 %v877_v46, -3e+38 }
 0x125   :  { %v847_v56 = vmax.f32 %v845_v47, -3e+38  ;;  %v844_v58 = vmax.f32 %v842_v48, -3e+38  ;;  %v420_v59 = vpop.f32.mrf.mxu0  ;;  %v500_v60 = vpop.f32.mrf.mxu1 }
 0x126   :  { %v884_v63 = vmax.f32 %v882_v52, -3e+38  ;;  %v881_v1 = vmax.f32 %v879_v53, -3e+38 }
 0x127   :  { %v849_v2 = vmax.f32 %v847_v56, -3e+38  ;;  %v846_v7 = vmax.f32 %v844_v58, -3e+38  ;;  %v422_v9 = vpop.f32.mrf.mxu0  ;;  %v502_v10 = vpop.f32.mrf.mxu1 }
 0x128   :  { %v886_v13 = vmax.f32 %v884_v63, -3e+38  ;;  %v883_v16 = vmax.f32 %v881_v1, -3e+38 }
 0x129   :  { %v851_v17 = vmax.f32 %v849_v2, -3e+38  ;;  %v848_v19 = vmax.f32 %v846_v7, -3e+38  ;;  %v424_v20 = vpop.f32.mrf.mxu0  ;;  %v504_v21 = vpop.f32.mrf.mxu1 }
 0x12a   :  { %v888_v23 = vmax.f32 %v886_v13, -3e+38  ;;  %v885_v26 = vmax.f32 %v883_v16, -3e+38 }
 0x12b   :  { %v853_v27 = vmax.f32 %v851_v17, -3e+38  ;;  %v850_v29 = vmax.f32 %v848_v19, -3e+38  ;;  %v428_v30 = vpop.f32.mrf.mxu0  ;;  %v508_v31 = vpop.f32.mrf.mxu1 }
 0x12c   :  { %v890_v32 = vmax.f32 %v888_v23, -3e+38  ;;  %v887_v33 = vmax.f32 %v885_v26, -3e+38 }
 0x12d   :  { %v855_v34 = vmax.f32 %v853_v27, -3e+38  ;;  %v852_v35 = vmax.f32 %v850_v29, -3e+38  ;;  %v430_v36 = vpop.f32.mrf.mxu0  ;;  %v510_v37 = vpop.f32.mrf.mxu1 }
 0x12e   :  { %v892_v39 = vmax.f32 %v890_v32, -3e+38  ;;  %v889_v40 = vmax.f32 %v887_v33, -3e+38 }
 0x12f   :  { %v857_v43 = vmax.f32 %v855_v34, -3e+38  ;;  %v854_v44 = vmax.f32 %v852_v35, -3e+38  ;;  %v432_v46 = vpop.f32.mrf.mxu0  ;;  %v512_v47 = vpop.f32.mrf.mxu1 }
 0x130   :  { %v894_v48 = vmax.f32 %v892_v39, -3e+38  ;;  %v891_v50 = vmax.f32 %v889_v40, -3e+38 }
 0x131   :  { %v859_v51 = vmax.f32 %v857_v43, -3e+38  ;;  %v856_v52 = vmax.f32 %v854_v44, -3e+38  ;;  %v434_v53 = vpop.f32.mrf.mxu0  ;;  %v514_v56 = vpop.f32.mrf.mxu1 }
 0x132   :  { %v896_v58 = vmax.f32 %v894_v48, -3e+38  ;;  %v893_v59 = vmax.f32 %v891_v50, -3e+38  ;;  %v1769_v56 = vadd.s32 64, %v1693_v54 }
 0x133   :  { %v858_v60 = vmax.f32 %v856_v52, -3e+38  ;;  %v438_v63 = vpop.f32.mrf.mxu0  ;;  %v518_v1 = vpop.f32.mrf.mxu1  ;;  %v861_v7 = vmax.f32 %v859_v51, -3e+38 }
 0x134   :  { %v895_v2 = vmax.f32 %v893_v59, -3e+38  ;;  %v898_v16 = vmax.f32 %v896_v58, -3e+38  ;;  %v1772_v58 = vadd.s32 72, %v1693_v54  ;;  %v1775_v59 = vadd.s32 80, %v1693_v54 }
 0x135   :  { %v860_v9 = vmax.f32 %v858_v60, -3e+38  ;;  %v440_v10 = vpop.f32.mrf.mxu0  ;;  %v520_v13 = vpop.f32.mrf.mxu1  ;;  %v863_v26 = vmax.f32 %v861_v7, -3e+38  ;;  %v1778_v60 = vadd.s32 88, %v1693_v54  ;;  %v1781_v63 = vadd.s32 96, %v1693_v54 }
 0x136   :  { %v897_v17 = vmax.f32 %v895_v2, -3e+38  ;;  %v900_v31 = vmax.f32 %v898_v16, -3e+38  ;;  %v1784_v1 = vadd.s32 104, %v1693_v54  ;;  %v1787_v7 = vadd.s32 112, %v1693_v54 }
 0x137   :  { %v862_v19 = vmax.f32 %v860_v9, -3e+38  ;;  %v442_v20 = vpop.f32.mrf.mxu0  ;;  %v522_v21 = vpop.f32.mrf.mxu1  ;;  %v1790_v9 = vadd.s32 120, %v1693_v54  ;;  %v1793_v10 = vadd.s32 128, %v1693_v54  ;;  %v1796_v13 = vadd.s32 136, %v1693_v54 }
 0x138   :  { %v899_v23 = vmax.f32 %v897_v17, -3e+38  ;;  %v1799_v16 = vadd.s32 144, %v1693_v54  ;;  %v1802_v17 = vadd.s32 152, %v1693_v54  ;;  %v1807_v21 = vadd.s32 160, %v1693_v54 }
 0x139   :  { %v864_v27 = vmax.f32 %v862_v19, -3e+38  ;;  %v444_v29 = vpop.f32.mrf.mxu0  ;;  %v524_v30 = vpop.f32.mrf.mxu1 }
 0x13a   :  { %v901_v32 = vmax.f32 %v899_v23, -3e+38  ;;  %2148 = vst [vmem:[#allocation8_spill] sm:$0xff] %v1799_v16  ;;  %2149 = vst [vmem:[#allocation9_spill] sm:$0xff] %v1807_v21  ;;  %v1810_v23 = vadd.s32 168, %v1693_v54  ;;  %v1827_v29 = vadd.s32 192, %v1693_v54 }
 0x13b   :  { %v865_v33 = vmax.f32 %v863_v26, %v864_v27  ;;  %v448_v34 = vpop.f32.mrf.mxu0  ;;  %v528_v35 = vpop.f32.mrf.mxu1  ;;  %v1813_v26 = vadd.s32 176, %v1693_v54  ;;  %v1824_v27 = vadd.s32 184, %v1693_v54  ;;  %v1830_v30 = vadd.s32 200, %v1693_v54 }
 0x13c   :  { %v902_v36 = vmax.f32 %v900_v31, %v901_v32  ;;  %2150 = vst [vmem:[#allocation10_spill] sm:$0xff] %v1810_v23  ;;  %v1512_v32 = vmov 1966171168  }
 0x13d   :  { %v866_v37 = vrot.slane %v865_v33, 4  ;;  %v450_v39 = vpop.f32.mrf.mxu0  ;;  %v530_v40 = vpop.f32.mrf.mxu1  ;;  %2151 = vst [vmem:[#allocation11_spill] sm:$0xff] %v1824_v27  ;;  %2152 = vst [vmem:[#allocation12_spill] sm:$0xff] %v1830_v30 }
 0x13e   :  { %v903_v44 = vrot.slane %v902_v36, 4  ;;  %v1850_v39 = vld [vmem:[#allocation2] sm:$0x3]  ;;  %v1853_v40 = vadd.s32 232, %v1693_v54 }
 0x13f   :  { %v867_v43 = vmax.f32 %v865_v33, %v866_v37  ;;  %v452_v46 = vpop.f32.mrf.mxu0  ;;  %v532_v47 = vpop.f32.mrf.mxu1  ;;  %v1846_v37 = vadd.s32 224, %v1693_v54 }
 0x140   :  { %v904_v53 = vmax.f32 %v902_v36, %v903_v44  ;;  %v1843_v36 = vadd.s32 216, %v1693_v54  ;;  %v1859_v46 = vsub.s32 1, %v1693_v54 }
 0x141   :  { %v868_v48 = vrot.slane %v867_v43, 2  ;;  %v454_v50 = vpop.f32.mrf.mxu0  ;;  %v534_v51 = vpop.f32.mrf.mxu1 }
 0x142   :  { %v905_v20 = vrot.slane %v904_v53, 2  ;;  %2153 = vst [vmem:[#allocation13_spill] sm:$0xff] %v1843_v36  ;;  %v1866_v50 = vadd.s32 248, %v1693_v54 }
 0x143   :  { %v869_v52 = vmax.f32 %v867_v43, %v868_v48  ;;  %v1856_v43 = vadd.s32 240, %v1693_v54 }
 0x144   :  { %v906_v31 = vmax.f32 %v904_v53, %v905_v20 }
 0x145   :  { %v870_v2 = vrot.slane %v869_v52, 1 }
 0x146   :  { %v907_v47 = vrot.slane %v906_v31, 1 }
 0x147   :  { %v1804_v19 = vmax.f32 %v869_v52, %v870_v2 }
 0x149   :  { %vm909_vm10 = vcmp.ge.f32.partialorder %v1725_v11, %v1804_v19  ;;  %vm911_vm11 = vcmp.ge.f32.partialorder %v1744_v22, %v1804_v19  ;;  %vm913_vm12 = vcmp.ge.f32.partialorder %v1722_v8, %v1804_v19  ;;  %vm915_vm13 = vcmp.ge.f32.partialorder %v1741_v18, %v1804_v19 }
 0x14a   :  { %v1833_v11 = vadd.s32 208, %v1693_v54  ;;  %v973_v22 = vsel %vm909_vm10, %v1693_v54, 2147483647  ;;  %v1837_v8 = vsub.s32 0, %v1693_v54  ;;  %v1206_v18 = vunpack.c.l.s4 %v1512_v32 }
 0x14b   :  { %v975_v33 = vsel %vm911_vm11, %v1710_v3, 2147483647  ;;  %v977_v34 = vsel %vm913_vm12, %v1698_v57, 2147483647  ;;  %v979_v35 = vsel %vm915_vm13, %v1707_v0, 2147483647  ;;  %vm917_vm14 = vcmp.ge.f32.partialorder %v1728_v12, %v1804_v19 }
 0x14c   :  { %vm1037_vm15 = vcmp.lt.s32.totalorder %v973_v22, %v977_v34  ;;  %vm919_vm0 = vcmp.ge.f32.partialorder %v1747_v24, %v1804_v19  ;;  %vm1039_vm2 = vcmp.lt.s32.totalorder %v975_v33, %v979_v35  ;;  %v1207_v48 = vunpack.c.0.s8 %v1206_v18  ;;  %v1863_v12 = vld [vmem:[#allocation2] sm:$0x3] }
 0x14d   :  { %v1038_v44 = vsel %vm1037_vm15, %v973_v22, %v977_v34  ;;  %v981_v51 = vsel %vm917_vm14, %v1703_v62, 2147483647  ;;  %v1040_v52 = vsel %vm1039_vm2, %v975_v33, %v979_v35  ;;  %vm921_vm3 = vcmp.ge.f32.partialorder %v1749_v25, %v1804_v19 }
 0x14e   :  { %vm923_vm4 = vcmp.ge.f32.partialorder %v1762_v38, %v1804_v19  ;;  %vm1324_vm5 = vcmp.le.f32.partialorder %v1804_v19, -3e+38  ;;  %vm1041_vm6 = vcmp.lt.s32.totalorder %v1038_v44, %v981_v51  ;;  %v983_v24 = vsel %vm919_vm0, %v1717_v5, 2147483647 }
 0x14f   :  { %v1042_v2 = vsel %vm1041_vm6, %v1038_v44, %v981_v51  ;;  %vm1043_vm7 = vcmp.lt.s32.totalorder %v1040_v52, %v983_v24  ;;  %v1881_v32 = vmax.f32 %v906_v31, %v907_v47  ;;  %v1884_v25 = vsub.s32 %v1207_v48, %v1693_v54 }
 0x150   :  { %v985_v18 = vsel %vm921_vm3, %v1720_v6, 2147483647  ;;  %v987_v33 = vsel %vm923_vm4, %v1737_v15, 2147483647  ;;  %v989_v34 = vsel %vm1324_vm5, %v1769_v56, 2147483647  ;;  %v1044_v35 = vsel %vm1043_vm7, %v1040_v52, %v983_v24 }
 0x151   :  { %v991_v31 = vsel %vm1324_vm5, %v1772_v58, 2147483647  ;;  %v993_v44 = vsel %vm1324_vm5, %v1775_v59, 2147483647  ;;  %v995_v47 = vsel %vm1324_vm5, %v1778_v60, 2147483647  ;;  %vm1045_vm8 = vcmp.lt.s32.totalorder %v1042_v2, %v985_v18 }
 0x152   :  { %v997_v48 = vsel %vm1324_vm5, %v1781_v63, 2147483647  ;;  %v999_v51 = vsel %vm1324_vm5, %v1784_v1, 2147483647  ;;  %v1046_v52 = vsel %vm1045_vm8, %v1042_v2, %v985_v18  ;;  %vm1047_vm9 = vcmp.lt.s32.totalorder %v1044_v35, %v987_v33 }
 0x153   :  { %v1001_v24 = vsel %vm1324_vm5, %v1787_v7, 2147483647  ;;  %v1003_v38 = vsel %vm1324_vm5, %v1790_v9, 2147483647  ;;  %v1048_v22 = vsel %vm1047_vm9, %v1044_v35, %v987_v33  ;;  %vm1049_vm10 = vcmp.lt.s32.totalorder %v1046_v52, %v989_v34 }
 0x154   :  { %v1005_v20 = vsel %vm1324_vm5, %v1793_v10, 2147483647  ;;  %v1007_v53 = vsel %vm1324_vm5, %v1796_v13, 2147483647  ;;  %v1050_v2 = vsel %vm1049_vm10, %v1046_v52, %v989_v34  ;;  %vm1051_vm11 = vcmp.lt.s32.totalorder %v1048_v22, %v991_v31 }
 0x155   :  { %vm910_vm12 = vcmp.ge.f32.partialorder %v1687_v45, %v1881_v32  ;;  %v1009_v18 = vsel %vm1324_vm5, %v1799_v16, 2147483647  ;;  %v1011_v33 = vsel %vm1324_vm5, %v1802_v17, 2147483647  ;;  %v1052_v35 = vsel %vm1051_vm11, %v1048_v22, %v991_v31 }
 0x156   :  { %vm1053_vm13 = vcmp.lt.s32.totalorder %v1050_v2, %v993_v44  ;;  %vm912_vm14 = vcmp.ge.f32.partialorder %v1689_v49, %v1881_v32  ;;  %v1013_v34 = vsel %vm1324_vm5, %v1807_v21, 2147483647  ;;  %v1015_v52 = vsel %vm1324_vm5, %v1810_v23, 2147483647 }
 0x157   :  { %v1054_v41 = vsel %vm1053_vm13, %v1050_v2, %v993_v44  ;;  %vm1055_vm15 = vcmp.lt.s32.totalorder %v1052_v35, %v995_v47  ;;  %v1017_v16 = vsel %vm1324_vm5, %v1813_v26, 2147483647  ;;  %v1019_v22 = vsel %vm1324_vm5, %v1824_v27, 2147483647 }
 0x158   :  { %v1056_v31 = vsel %vm1055_vm15, %v1052_v35, %v995_v47  ;;  %vm1057_vm0 = vcmp.lt.s32.totalorder %v1054_v41, %v997_v48  ;;  %v1021_v21 = vsel %vm1324_vm5, %v1827_v29, 2147483647  ;;  %v1023_v23 = vsel %vm1324_vm5, %v1830_v30, 2147483647 }
 0x159   :  { %v1058_v44 = vsel %vm1057_vm0, %v1054_v41, %v997_v48  ;;  %vm1059_vm2 = vcmp.lt.s32.totalorder %v1056_v31, %v999_v51  ;;  %v1025_v2 = vsel %vm1324_vm5, %v1833_v11, 2147483647  ;;  %v1027_v27 = vsel %vm1324_vm5, %v1843_v36, 2147483647 }
 0x15a   :  { %v1060_v47 = vsel %vm1059_vm2, %v1056_v31, %v999_v51  ;;  %vm1061_vm3 = vcmp.lt.s32.totalorder %v1058_v44, %v1001_v24  ;;  %v1029_v35 = vsel %vm1324_vm5, %v1846_v37, 2147483647  ;;  %v1031_v30 = vsel %vm1324_vm5, %v1853_v40, 2147483647 }
 0x15b   :  { %v1062_v41 = vsel %vm1061_vm3, %v1058_v44, %v1001_v24  ;;  %vm1063_vm4 = vcmp.lt.s32.totalorder %v1060_v47, %v1003_v38  ;;  %v1033_v48 = vsel %vm1324_vm5, %v1856_v43, 2147483647  ;;  %v1966_v36 = vsel %vm1324_vm5, %v1866_v50, 2147483647 }
 0x15c   :  { %v1064_v51 = vsel %vm1063_vm4, %v1060_v47, %v1003_v38  ;;  %vm1065_vm6 = vcmp.lt.s32.totalorder %v1062_v41, %v1005_v20  ;;  %vm914_vm8 = vcmp.ge.f32.partialorder %v1695_v55, %v1881_v32  ;;  %vm916_vm9 = vcmp.ge.f32.partialorder %v1700_v61, %v1881_v32 }
 0x15d   :  { %v1066_v31 = vsel %vm1065_vm6, %v1062_v41, %v1005_v20  ;;  %vm1067_vm7 = vcmp.lt.s32.totalorder %v1064_v51, %v1007_v53  ;;  %vm918_vm11 = vcmp.ge.f32.partialorder %v1714_v4, %v1881_v32  ;;  %vm920_vm13 = vcmp.ge.f32.partialorder %v1733_v14, %v1881_v32 }
 0x15e   :  { %v1068_v24 = vsel %vm1067_vm7, %v1064_v51, %v1007_v53  ;;  %vm1069_vm10 = vcmp.lt.s32.totalorder %v1066_v31, %v1009_v18  ;;  %vm922_vm15 = vcmp.ge.f32.partialorder %v1754_v28, %v1881_v32  ;;  %vm924_vm0 = vcmp.ge.f32.partialorder %v1765_v42, %v1881_v32 }
 0x15f   :  { %v1070_v44 = vsel %vm1069_vm10, %v1066_v31, %v1009_v18  ;;  %vm1071_vm5 = vcmp.lt.s32.totalorder %v1068_v24, %v1011_v33  ;;  %vm1325_vm3 = vcmp.le.f32.partialorder %v1881_v32, -3e+38  ;;  %v974_v53 = vsel %vm910_vm12, %v1693_v54, 2147483647 }
 0x160   :  { %v1072_v20 = vsel %vm1071_vm5, %v1068_v24, %v1011_v33  ;;  %vm1073_vm2 = vcmp.lt.s32.totalorder %v1070_v44, %v1013_v34  ;;  %v976_v18 = vsel %vm912_vm14, %v1710_v3, 2147483647  ;;  %v978_v33 = vsel %vm914_vm8, %v1698_v57, 2147483647 }
 0x161   :  { %v1074_v38 = vsel %vm1073_vm2, %v1070_v44, %v1013_v34  ;;  %vm1075_vm4 = vcmp.lt.s32.totalorder %v1072_v20, %v1015_v52  ;;  %v980_v45 = vsel %vm916_vm9, %v1707_v0, 2147483647  ;;  %v982_v54 = vsel %vm918_vm11, %v1703_v62, 2147483647 }
 0x162   :  { %v1076_v47 = vsel %vm1075_vm4, %v1072_v20, %v1015_v52  ;;  %vm1077_vm6 = vcmp.lt.s32.totalorder %v1074_v38, %v1017_v16  ;;  %v984_v49 = vsel %vm920_vm13, %v1717_v5, 2147483647  ;;  %v986_v55 = vsel %vm922_vm15, %v1720_v6, 2147483647 }
 0x163   :  { %v1078_v34 = vsel %vm1077_vm6, %v1074_v38, %v1017_v16  ;;  %vm1079_vm12 = vcmp.lt.s32.totalorder %v1076_v47, %v1019_v22  ;;  %v988_v61 = vsel %vm924_vm0, %v1737_v15, 2147483647  ;;  %v990_v62 = vsel %vm1325_vm3, %v1769_v56, 2147483647 }
 0x164   :  { %v1080_v57 = vsel %vm1079_vm12, %v1076_v47, %v1019_v22  ;;  %vm1081_vm14 = vcmp.lt.s32.totalorder %v1078_v34, %v1021_v21  ;;  %v992_v3 = vsel %vm1325_vm3, %v1772_v58, 2147483647  ;;  %v994_v4 = vsel %vm1325_vm3, %v1775_v59, 2147483647 }
 0x165   :  { %v1082_v0 = vsel %vm1081_vm14, %v1078_v34, %v1021_v21  ;;  %vm1083_vm7 = vcmp.lt.s32.totalorder %v1080_v57, %v1023_v23  ;;  %v996_v6 = vsel %vm1325_vm3, %v1778_v60, 2147483647  ;;  %vm1108_vm9 = vcmp.lt.s32.totalorder %v974_v53, %v978_v33 }
 0x166   :  { %v1084_v5 = vsel %vm1083_vm7, %v1080_v57, %v1023_v23  ;;  %vm1085_vm8 = vcmp.lt.s32.totalorder %v1082_v0, %v1025_v2  ;;  %v1109_v15 = vsel %vm1108_vm9, %v974_v53, %v978_v33  ;;  %vm1110_vm11 = vcmp.lt.s32.totalorder %v976_v18, %v980_v45 }
 0x167   :  { %v1086_v14 = vsel %vm1085_vm8, %v1082_v0, %v1025_v2  ;;  %vm1087_vm10 = vcmp.lt.s32.totalorder %v1084_v5, %v1027_v27  ;;  %v1111_v42 = vsel %vm1110_vm11, %v976_v18, %v980_v45  ;;  %vm1112_vm5 = vcmp.lt.s32.totalorder %v1109_v15, %v982_v54 }
 0x168   :  { %v1088_v28 = vsel %vm1087_vm10, %v1084_v5, %v1027_v27  ;;  %vm1089_vm13 = vcmp.lt.s32.totalorder %v1086_v14, %v1029_v35  ;;  %v1113_v58 = vsel %vm1112_vm5, %v1109_v15, %v982_v54  ;;  %vm1114_vm0 = vcmp.lt.s32.totalorder %v1111_v42, %v984_v49 }
 0x169   :  { %v1090_v56 = vsel %vm1089_vm13, %v1086_v14, %v1029_v35  ;;  %vm1091_vm15 = vcmp.lt.s32.totalorder %v1088_v28, %v1031_v30  ;;  %v1115_v16 = vsel %vm1114_vm0, %v1111_v42, %v984_v49  ;;  %vm1116_vm4 = vcmp.lt.s32.totalorder %v1113_v58, %v986_v55  ;;  %v2166_v14 = vld [vmem:[#allocation11_spill] sm:$0xff] }
 0x16a   :  { %v1092_v59 = vsel %vm1091_vm15, %v1088_v28, %v1031_v30  ;;  %vm1093_vm2 = vcmp.lt.s32.totalorder %v1090_v56, %v1033_v48  ;;  %v1117_v60 = vsel %vm1116_vm4, %v1113_v58, %v986_v55  ;;  %vm1118_vm12 = vcmp.lt.s32.totalorder %v1115_v16, %v988_v61 }
 0x16b   :  { %v1094_v21 = vsel %vm1093_vm2, %v1090_v56, %v1033_v48  ;;  %vm1095_vm6 = vcmp.lt.s32.totalorder %v1092_v59, %v1966_v36  ;;  %v1119_v52 = vsel %vm1118_vm12, %v1115_v16, %v988_v61  ;;  %vm1120_vm14 = vcmp.lt.s32.totalorder %v1117_v60, %v990_v62 }
 0x16c   :  { %v1096_v23 = vsel %vm1095_vm6, %v1092_v59, %v1966_v36  ;;  %v2154_v27 = vrot.slane %v1850_v39, %v1837_v8  ;;  %v1121_v30 = vsel %vm1120_vm14, %v1117_v60, %v990_v62  ;;  %vm1122_vm9 = vcmp.lt.s32.totalorder %v1119_v52, %v992_v3  ;;  %v2167_v59 = vld [vmem:[#allocation12_spill] sm:$0xff] }
 0x16d   :  { %vm1097_vm8 = vcmp.lt.s32.totalorder %v1094_v21, %v1096_v23  ;;  %v2157_v2 = vrot.slane %v1850_v39, %v1859_v46  ;;  %v998_v36 = vsel %vm1325_vm3, %v1781_v63, 2147483647  ;;  %v1123_v41 = vsel %vm1122_vm9, %v1119_v52, %v992_v3  ;;  %v2165_v3 = vld [vmem:[#allocation10_spill] sm:$0xff]  ;;  %v2168_v52 = vld [vmem:[#allocation13_spill] sm:$0xff] }
 0x16e   :  { %vm2031_vm7 = vcmp.gt.f32.partialorder %v1804_v19, %v2154_v27  ;;  %vm1124_vm11 = vcmp.lt.s32.totalorder %v1121_v30, %v994_v4  ;;  %v2160_v48 = vrot.slane %v1863_v12, %v1837_v8  ;;  %v1000_v39 = vsel %vm1325_vm3, %v1784_v1, 2147483647 }
 0x16f   :  { %vm2039_vm10 = vcmp.gt.f32.partialorder %v1881_v32, %v2157_v2  ;;  %v1125_v31 = vsel %vm1124_vm11, %v1121_v30, %v994_v4  ;;  %vm1126_vm13 = vcmp.lt.s32.totalorder %v1123_v41, %v996_v6  ;;  %v2161_v24 = vrot.slane %v1863_v12, %v1859_v46 }
 0x170   :  { %v1236_v51 = vsel %vm2031_vm7, %v1804_v19, %v2160_v48  ;;  %v1127_v44 = vsel %vm1126_vm13, %v1123_v41, %v996_v6  ;;  %vm1128_vm5 = vcmp.lt.s32.totalorder %v1125_v31, %v998_v36  ;;  %v1098_v20 = vsel %vm1097_vm8, %v1094_v21, %v1096_v23 }
 0x171   :  { %v1237_v63 = vsel %vm2039_vm10, %v1881_v32, %v2161_v24  ;;  %v1002_v19 = vsel %vm1325_vm3, %v1787_v7, 2147483647  ;;  %v1129_v38 = vsel %vm1128_vm5, %v1125_v31, %v998_v36  ;;  %vm1130_vm15 = vcmp.lt.s32.totalorder %v1127_v44, %v1000_v39 }
 0x172   :  { %v1240_v53 = vcombine.low %v1236_v51, %v1237_v63  ;;  %v1004_v1 = vsel %vm1325_vm3, %v1790_v9, 2147483647  ;;  %v1131_v18 = vsel %vm1130_vm15, %v1127_v44, %v1000_v39  ;;  %vm1132_vm0 = vcmp.lt.s32.totalorder %v1129_v38, %v1002_v19  ;;  %v2162_v9 = vld [vmem:[#allocation8_spill] sm:$0xff] }
 0x173   :  { %v1006_v33 = vsel %vm1325_vm3, %v1793_v10, 2147483647  ;;  %v1133_v47 = vsel %vm1132_vm0, %v1129_v38, %v1002_v19  ;;  %vm1134_vm2 = vcmp.lt.s32.totalorder %v1131_v18, %v1004_v1  ;;  %v1099_v45 = vrot.slane %v1098_v20, 4 }
 0x174   :  { %v1247_v12 = vrot.slane %v1240_v53, %v1884_v25  ;;  %v1008_v7 = vsel %vm1325_vm3, %v1796_v13, 2147483647  ;;  %v1135_v54 = vsel %vm1134_vm2, %v1131_v18, %v1004_v1  ;;  %vm1136_vm4 = vcmp.lt.s32.totalorder %v1133_v47, %v1006_v33  ;;  %v2164_v13 = vld [vmem:[#allocation9_spill] sm:$0xff] }
 0x175   :  { %v1010_v49 = vsel %vm1325_vm3, %v2162_v9, 2147483647  ;;  %v1137_v55 = vsel %vm1136_vm4, %v1133_v47, %v1006_v33  ;;  %vm1138_vm6 = vcmp.lt.s32.totalorder %v1135_v54, %v1008_v7  ;;  %v1012_v10 = vsel %vm1325_vm3, %v1802_v17, 2147483647 }
 0x176   :  { %v1254_v34 = vrot.slane %v1247_v12, %v1884_v25  ;;  %v1139_v57 = vsel %vm1138_vm6, %v1135_v54, %v1008_v7  ;;  %vm1140_vm12 = vcmp.lt.s32.totalorder %v1137_v55, %v1010_v49  ;;  %v1014_v62 = vsel %vm1325_vm3, %v2164_v13, 2147483647 }
 0x177   :  { %v1141_v0 = vsel %vm1140_vm12, %v1137_v55, %v1010_v49  ;;  %vm1142_vm14 = vcmp.lt.s32.totalorder %v1139_v57, %v1012_v10  ;;  %vm1100_vm8 = vcmp.lt.s32.totalorder %v1098_v20, %v1099_v45  ;;  %v1016_v4 = vsel %vm1325_vm3, %v2165_v3, 2147483647 }
 0x178   :  { %1256 = vst.msk [vmem:[#allocation2] sm:$0x3] %vm1681_vm1, %v1254_v34  ;;  %v1143_v5 = vsel %vm1142_vm14, %v1139_v57, %v1012_v10  ;;  %vm1144_vm9 = vcmp.lt.s32.totalorder %v1141_v0, %v1014_v62  ;;  %v1018_v17 = vsel %vm1325_vm3, %v1813_v26, 2147483647  ;;  %v1020_v15 = vsel %vm1325_vm3, %v2166_v14, 2147483647 }
 0x179   :  { %v1145_v6 = vsel %vm1144_vm9, %v1141_v0, %v1014_v62  ;;  %vm1146_vm11 = vcmp.lt.s32.totalorder %v1143_v5, %v1016_v4  ;;  %v1101_v42 = vsel %vm1100_vm8, %v1098_v20, %v1099_v45  ;;  %v1022_v56 = vsel %vm1325_vm3, %v1827_v29, 2147483647 }
 0x17a   :  { %v1147_v28 = vsel %vm1146_vm11, %v1143_v5, %v1016_v4  ;;  %vm1148_vm13 = vcmp.lt.s32.totalorder %v1145_v6, %v1018_v17  ;;  %v1024_v16 = vsel %vm1325_vm3, %v2167_v59, 2147483647  ;;  %v1026_v21 = vsel %vm1325_vm3, %v1833_v11, 2147483647 }
 0x17b   :  { %v1149_v58 = vsel %vm1148_vm13, %v1145_v6, %v1018_v17  ;;  %vm1150_vm5 = vcmp.lt.s32.totalorder %v1147_v28, %v1020_v15  ;;  %v1102_v23 = vrot.slane %v1101_v42, 2  ;;  %v1028_v27 = vsel %vm1325_vm3, %v2168_v52, 2147483647 }
 0x17c   :  { %v1151_v26 = vsel %vm1150_vm5, %v1147_v28, %v1020_v15  ;;  %vm1152_vm15 = vcmp.lt.s32.totalorder %v1149_v58, %v1022_v56  ;;  %v1030_v30 = vsel %vm1325_vm3, %v1846_v37, 2147483647  ;;  %v1032_v36 = vsel %vm1325_vm3, %v1853_v40, 2147483647 }
 0x17d   :  { %v1153_v60 = vsel %vm1152_vm15, %v1149_v58, %v1022_v56  ;;  %vm1154_vm0 = vcmp.lt.s32.totalorder %v1151_v26, %v1024_v16  ;;  %v1034_v41 = vsel %vm1325_vm3, %v1856_v43, 2147483647  ;;  %vm1103_vm14 = vcmp.lt.s32.totalorder %v1101_v42, %v1102_v23  ;;  %v1193_v43 = vld [vmem:[#allocation3] sm:$0x3] }
 0x17e   :  { %v1155_v29 = vsel %vm1154_vm0, %v1151_v26, %v1024_v16  ;;  %vm1156_vm2 = vcmp.lt.s32.totalorder %v1153_v60, %v1026_v21  ;;  %v1036_v51 = vsel %vm1325_vm3, %v1866_v50, 2147483647  ;;  %v1104_v24 = vsel %vm1103_vm14, %v1101_v42, %v1102_v23 }
 0x17f   :  { %v1157_v2 = vsel %vm1156_vm2, %v1153_v60, %v1026_v21  ;;  %vm1158_vm4 = vcmp.lt.s32.totalorder %v1155_v29, %v1028_v27  ;;  %v1105_v63 = vrot.slane %v1104_v24, 1  ;;  %v1197_v19 = vrot.slane %v1193_v43, %v1837_v8 }
 0x180   :  { %v1159_v11 = vsel %vm1158_vm4, %v1155_v29, %v1028_v27  ;;  %vm1160_vm6 = vcmp.lt.s32.totalorder %v1157_v2, %v1030_v30  ;;  %v1201_v1 = vrot.slane %v1193_v43, %v1859_v46 }
 0x181   :  { %v1161_v48 = vsel %vm1160_vm6, %v1157_v2, %v1030_v30  ;;  %vm1162_vm12 = vcmp.lt.s32.totalorder %v1159_v11, %v1032_v36  ;;  %vm1106_vm5 = vcmp.lt.s32.totalorder %v1104_v24, %v1105_v63 }
 0x182   :  { %v1163_v37 = vsel %vm1162_vm12, %v1159_v11, %v1032_v36  ;;  %vm1164_vm8 = vcmp.lt.s32.totalorder %v1161_v48, %v1034_v41  ;;  %v1107_v32 = vsel %vm1106_vm5, %v1104_v24, %v1105_v63 }
 0x183   :  { %v1165_v39 = vsel %vm1164_vm8, %v1161_v48, %v1034_v41  ;;  %vm1166_vm9 = vcmp.lt.s32.totalorder %v1163_v37, %v1036_v51  ;;  %v1202_v18 = vsel %vm2031_vm7, %v1107_v32, %v1197_v19 }
 0x184   :  { %v1167_v31 = vsel %vm1166_vm9, %v1163_v37, %v1036_v51 }
 0x185   :  { %vm1168_vm11 = vcmp.lt.s32.totalorder %v1165_v39, %v1167_v31 }
 0x186   :  { %v1169_v40 = vsel %vm1168_vm11, %v1165_v39, %v1167_v31 }
 0x187   :  { %v1170_v44 = vrot.slane %v1169_v40, 4 }
 0x189   :  { %vm1171_vm13 = vcmp.lt.s32.totalorder %v1169_v40, %v1170_v44 }
 0x18a   :  { %v1172_v20 = vsel %vm1171_vm13, %v1169_v40, %v1170_v44 }
 0x18b   :  { %v1173_v53 = vrot.slane %v1172_v20, 2 }
 0x18d   :  { %vm1174_vm15 = vcmp.lt.s32.totalorder %v1172_v20, %v1173_v53 }
 0x18e   :  { %v1175_v50 = vsel %vm1174_vm15, %v1172_v20, %v1173_v53 }
 0x18f   :  { %v1176_v38 = vrot.slane %v1175_v50, 1 }
 0x191   :  { %vm1177_vm3 = vcmp.lt.s32.totalorder %v1175_v50, %v1176_v38 }
 0x192   :  { %v1178_v12 = vsel %vm1177_vm3, %v1175_v50, %v1176_v38 }
 0x193   :  { %v1203_v33 = vsel %vm2039_vm10, %v1178_v12, %v1201_v1 }
 0x194   :  { %v1204_v47 = vcombine.low %v1202_v18, %v1203_v33 }
 0x196   :  { %v1211_v45 = vrot.slane %v1204_v47, %v1884_v25 }
 0x198   :  { %v1218_v7 = vrot.slane %v1211_v45, %v1884_v25 }
 0x19a   :  { %1223 = vst.msk [vmem:[#allocation3] sm:$0x3] %vm1681_vm1, %v1218_v7 }
 0x1a1   :  { %v1260_v8 = vld [vmem:[#allocation3] sm:$0x3] }
 0x1a2   :  { %1261 = vst.msk [vmem:[#allocation4] sm:$0x3] %vm1681_vm1, %v1260_v8 }
 0x1a3   :  { %1499 = shalt.err (!%p1496_p4)
}
 0x1a4   :  { %1271 = dma.vmem_to_hbm [thread:$0]  %s1269_s16, 32, %s2136_s2, [#allocation5]  }
 0x1a5   :  { %1508 = dma.done.wait [#allocation5], 32  }
 0x1a6   :  { %1509 = vsyncadd [#allocation5], 4294967264 }
 0x1a7   :  { %1275 = vsyncpa [#allocation5], 1 }

</bundles_post_ra>
